<compile_context>
chip_gen: v7x
topology: tpu7x:2x2x1
jax: 0.10.0
libtpu: 0.0.40
codegen_flags: <defaults>
</compile_context>

<pallas_src>
import functools

import jax
import jax.numpy as jnp
from jax import lax
from jax.experimental import pallas as pl
from jax.experimental.pallas import tpu as pltpu


def _round_up(x, m):
    return ((x + m - 1) // m) * m


def _qnet_kernel(hidden_dim, action_dim,
                 x_ref, w1t_ref, w2t_ref, w3t_ref, b_ref, oT_ref):
    # x_ref : (tb, state_dim) f32  -- natural layout, batch on sublanes.
    # w1t   : (hidden, state)  f32;  w2t: (hidden, hidden) bf16;  w3t: (action, hidden) bf16
    # b_ref : (2*hidden + action, 1) f32;  oT_ref: (action, tb) f32 (batch lane-dense).
    x = x_ref[...]

    # fc1 + ReLU: contract over state_dim (dim 1 of both operands) -> (hidden, tb).
    # This is the transposed-RHS ("NT") matmul form; no host- or kernel-side
    # materialised transpose of the big x stream is needed.
    h = lax.dot_general(w1t_ref[...], x,
                        dimension_numbers=(((1,), (1,)), ((), ())),
                        preferred_element_type=jnp.float32)
    h = jnp.maximum(h + b_ref[0:hidden_dim, :], 0.0)

    # fc2 + ReLU: (hidden, hidden) @ (hidden, tb) -> (hidden, tb), bf16 MXU, f32 acc.
    h = jnp.dot(w2t_ref[...], h.astype(jnp.bfloat16),
                preferred_element_type=jnp.float32)
    h = jnp.maximum(h + b_ref[hidden_dim:2 * hidden_dim, :], 0.0)

    # fc3 (no activation): (action, hidden) @ (hidden, tb) -> (action, tb).
    o = jnp.dot(w3t_ref[...], h.astype(jnp.bfloat16),
                preferred_element_type=jnp.float32)
    oT_ref[...] = (o + b_ref[2 * hidden_dim:2 * hidden_dim + action_dim, :]
                   ).astype(oT_ref.dtype)


def qnet_reference(x, params):
    """Pure-JAX (f32) reference — also serves as the small-batch fast path."""
    w1, b1, w2, b2, w3, b3 = params
    h1 = jnp.maximum(x @ w1 + b1, 0.0)
    h2 = jnp.maximum(h1 @ w2 + b2, 0.0)
    return h2 @ w3 + b3


def qnet_forward(x, params, *, block_batch=8192, use_pallas=None,
                 small_batch_xla=1024):
    """QNetDiscrete forward: x (B, state_dim) f32 -> (B, action_dim) f32."""
    w1, b1, w2, b2, w3, b3 = params          # W stored (in, out); b stored (1, out)
    batch, state_dim = x.shape
    hidden_dim = w1.shape[1]
    action_dim = w3.shape[1]
    x = x.astype(jnp.float32)

    # Small-batch fast path: XLA fuses the whole ~5K-param net into one tiny
    # kernel and beats any pallas_call launch at RL-inference batch sizes.
    if use_pallas is None:
        use_pallas = batch >= small_batch_xla
    if not use_pallas:
        return qnet_reference(x, params)

    # Lane-dense batch tile (multiple of 128).  Capped at ceil(B/2) rounded to
    # 128 so batches spanning more than one tile always yield >= 2 tiles
    # (v7x has 2 TensorCores); capped at 16K to keep VMEM modest everywhere.
    half = _round_up(max(-(-batch // 2), 1), 128)
    tb = max(128, min(block_batch, 16384, half))
    num_tiles = pl.cdiv(batch, tb)

    # Pre-transpose weights once to (out, in).  w2/w3 -> bf16 (dominant flops);
    # w1 stays f32 (tiny, and keeps the transposed-x contraction in f32).
    w1t = w1.T.astype(jnp.float32)
    w2t = w2.T.astype(jnp.bfloat16)
    w3t = w3.T.astype(jnp.bfloat16)
    bcat = jnp.concatenate(
        [b1.reshape(-1), b2.reshape(-1), b3.reshape(-1)]).astype(jnp.float32)
    bcat = bcat.reshape(-1, 1)                                   # (2*hidden+action, 1)

    flops = 2 * batch * (state_dim * hidden_dim
                         + hidden_dim * hidden_dim
                         + hidden_dim * action_dim)
    bytes_accessed = (4 * x.size + 4 * w1t.size + 2 * (w2t.size + w3t.size)
                      + 4 * bcat.size + 4 * action_dim * batch)

    kernel = functools.partial(_qnet_kernel, hidden_dim, action_dim)

    oT = pl.pallas_call(
        kernel,
        out_shape=jax.ShapeDtypeStruct((action_dim, batch), jnp.float32),
        grid=(num_tiles,),
        in_specs=[
            pl.BlockSpec((tb, state_dim), lambda i: (i, 0)),             # x tile (natural layout)
            pl.BlockSpec((hidden_dim, state_dim), lambda i: (0, 0)),     # W1^T (resident)
            pl.BlockSpec((hidden_dim, hidden_dim), lambda i: (0, 0)),    # W2^T (resident)
            pl.BlockSpec((action_dim, hidden_dim), lambda i: (0, 0)),    # W3^T (resident)
            pl.BlockSpec((2 * hidden_dim + action_dim, 1), lambda i: (0, 0)),  # biases
        ],
        out_specs=pl.BlockSpec((action_dim, tb), lambda i: (0, i)),      # lane-dense out^T
        compiler_params=pltpu.CompilerParams(
            dimension_semantics=("parallel",),
            vmem_limit_bytes=48 * 1024 * 1024,    # above v5e's 16 MiB scoped default
        ),
        cost_estimate=pl.CostEstimate(
            flops=flops, transcendentals=0, bytes_accessed=bytes_accessed),
    )(x, w1t, w2t, w3t, bcat)

    # Only the small (action_dim, B) output gets a host-side transpose; the
    # dominant x stream never does.  Columns >= B simply don't exist (no pad).
    return oT.T


def init_params(key, state_dim, action_dim, hidden_dim):
    """Deterministic synthetic parameter init (PyTorch-style uniform bounds)."""
    ks = jax.random.split(key, 6)

    def linear(kw, kb, fan_in, fan_out):
        bound = 1.0 / jnp.sqrt(fan_in)
        # stored as (in, out) so y = x @ W + b  (== PyTorch x @ W.T + b)
        w = jax.random.uniform(kw, (fan_in, fan_out), jnp.float32, -bound, bound)
        b = jax.random.uniform(kb, (1, fan_out), jnp.float32, -bound, bound)
        return w, b

    w1, b1 = linear(ks[0], ks[1], state_dim, hidden_dim)
    w2, b2 = linear(ks[2], ks[3], hidden_dim, hidden_dim)
    w3, b3 = linear(ks[4], ks[5], hidden_dim, action_dim)
    return (w1, b1, w2, b2, w3, b3)


if __name__ == "__main__":
    state_dim, action_dim, hidden_dim = 8, 4, 64   # PyTorch defaults

    key = jax.random.PRNGKey(0)
    kx1, kx2, kx3, kp = jax.random.split(key, 4)
    params = init_params(kp, state_dim, action_dim, hidden_dim)

    # bf16 matmuls for layers 2/3 => relax tolerance vs. the f32 reference.
    TOL = dict(atol=3e-2, rtol=3e-2)

    # 1) Tiny batch forced through the Pallas kernel (single partial tile).
    x_small = jax.random.normal(kx1, (2, state_dim), dtype=jnp.float32)
    out_small = jax.block_until_ready(qnet_forward(x_small, params, use_pallas=True))
    ref_small = qnet_reference(x_small, params)
    assert out_small.shape == (2, action_dim)
    assert jnp.allclose(out_small, ref_small, **TOL), "mismatch (small batch)"

    # 2) Non-tile-multiple batch -> 2 tiles (>=2-tile rule for v7x) with a
    #    partial last block, still forced through Pallas.
    x_mid = jax.random.normal(kx2, (300, state_dim), dtype=jnp.float32)
    out_mid = jax.block_until_ready(qnet_forward(x_mid, params, use_pallas=True))
    ref_mid = qnet_reference(x_mid, params)
    assert out_mid.shape == (300, action_dim)
    assert jnp.allclose(out_mid, ref_mid, **TOL), "mismatch (tiled batch)"

    # 3) Default auto path for an RL-style inference batch (XLA fast path).
    x_tiny = jax.random.normal(kx3, (5, state_dim), dtype=jnp.float32)
    out_tiny = jax.block_until_ready(qnet_forward(x_tiny, params))
    ref_tiny = qnet_reference(x_tiny, params)
    assert out_tiny.shape == (5, action_dim)
    assert jnp.allclose(out_tiny, ref_tiny, atol=1e-5, rtol=1e-5), "mismatch (xla path)"

    print("KERNEL_OK")
</pallas_src>

<mosaic_0001>
module attributes {stable_mosaic.version = 11 : i64} {
  func.func @_qnet_kernel(%arg0: i32, %arg1: memref<128x8xf32, #tpu.memory_space<vmem>>, %arg2: memref<64x8xf32, #tpu.memory_space<vmem>>, %arg3: memref<64x64xbf16, #tpu.memory_space<vmem>>, %arg4: memref<4x64xbf16, #tpu.memory_space<vmem>>, %arg5: memref<132x1xf32, #tpu.memory_space<vmem>>, %arg6: memref<4x128xf32, #tpu.memory_space<vmem>>) attributes {dimension_semantics = [#tpu.dimension_semantics<parallel>], iteration_bounds = array<i64: 1>, scalar_prefetch = 0 : i64, scratch_operands = 0 : i64, tpu.core_type = #tpu.core_type<tc>, window_params = [{transform_indices = @transform_0, window_bounds = array<i64: 128, 8>}, {pipeline_mode = #tpu.pipeline_mode<synchronous>, transform_indices = @transform_1, window_bounds = array<i64: 64, 8>}, {pipeline_mode = #tpu.pipeline_mode<synchronous>, transform_indices = @transform_2, window_bounds = array<i64: 64, 64>}, {pipeline_mode = #tpu.pipeline_mode<synchronous>, transform_indices = @transform_3, window_bounds = array<i64: 4, 64>}, {pipeline_mode = #tpu.pipeline_mode<synchronous>, transform_indices = @transform_4, window_bounds = array<i64: 132, 1>}, {transform_indices = @transform_5, window_bounds = array<i64: 4, 128>}]} {
    %c0 = arith.constant 0 : index
    %c0_0 = arith.constant 0 : index
    %0 = vector.load %arg1[%c0, %c0_0] : memref<128x8xf32, #tpu.memory_space<vmem>>, vector<128x8xf32>
    %c0_1 = arith.constant 0 : index
    %c0_2 = arith.constant 0 : index
    %1 = vector.load %arg2[%c0_1, %c0_2] : memref<64x8xf32, #tpu.memory_space<vmem>>, vector<64x8xf32>
    %cst = arith.constant dense<0.000000e+00> : vector<64x128xf32>
    %2 = tpu.matmul %1, %0, %cst {dimension_numbers = #tpu.dot_dimension_numbers<[1], [1], [0], [0], [0, 0, 1, 0], [], []>} : vector<64x8xf32>, vector<128x8xf32>, vector<64x128xf32> -> vector<64x128xf32>
    %c0_3 = arith.constant 0 : index
    %c0_4 = arith.constant 0 : index
    %3 = vector.load %arg5[%c0_3, %c0_4] : memref<132x1xf32, #tpu.memory_space<vmem>>, vector<64x1xf32>
    %4 = vector.broadcast %3 : vector<64x1xf32> to vector<64x128xf32>
    %5 = arith.addf %2, %4 : vector<64x128xf32>
    %cst_5 = arith.constant 0.000000e+00 : f32
    %6 = vector.broadcast %cst_5 : f32 to vector<64x128xf32>
    %7 = arith.maximumf %5, %6 : vector<64x128xf32>
    %c0_6 = arith.constant 0 : index
    %c0_7 = arith.constant 0 : index
    %8 = vector.load %arg3[%c0_6, %c0_7] : memref<64x64xbf16, #tpu.memory_space<vmem>>, vector<64x64xbf16>
    %9 = arith.truncf %7 : vector<64x128xf32> to vector<64x128xbf16>
    %cst_8 = arith.constant dense<0.000000e+00> : vector<64x128xf32>
    %10 = tpu.matmul %8, %9, %cst_8 {dimension_numbers = #tpu.dot_dimension_numbers<[1], [0], [0], [1], [0, 0, 1, 1], [], []>} : vector<64x64xbf16>, vector<64x128xbf16>, vector<64x128xf32> -> vector<64x128xf32>
    %c64 = arith.constant 64 : index
    %c0_9 = arith.constant 0 : index
    %11 = vector.load %arg5[%c64, %c0_9] : memref<132x1xf32, #tpu.memory_space<vmem>>, vector<64x1xf32>
    %12 = vector.broadcast %11 : vector<64x1xf32> to vector<64x128xf32>
    %13 = arith.addf %10, %12 : vector<64x128xf32>
    %cst_10 = arith.constant 0.000000e+00 : f32
    %14 = vector.broadcast %cst_10 : f32 to vector<64x128xf32>
    %15 = arith.maximumf %13, %14 : vector<64x128xf32>
    %c0_11 = arith.constant 0 : index
    %c0_12 = arith.constant 0 : index
    %16 = vector.load %arg4[%c0_11, %c0_12] : memref<4x64xbf16, #tpu.memory_space<vmem>>, vector<4x64xbf16>
    %17 = arith.truncf %15 : vector<64x128xf32> to vector<64x128xbf16>
    %cst_13 = arith.constant dense<0.000000e+00> : vector<4x128xf32>
    %18 = tpu.matmul %16, %17, %cst_13 {dimension_numbers = #tpu.dot_dimension_numbers<[1], [0], [0], [1], [0, 0, 1, 1], [], []>} : vector<4x64xbf16>, vector<64x128xbf16>, vector<4x128xf32> -> vector<4x128xf32>
    %c128 = arith.constant 128 : index
    %c0_14 = arith.constant 0 : index
    %19 = vector.load %arg5[%c128, %c0_14] : memref<132x1xf32, #tpu.memory_space<vmem>>, vector<4x1xf32>
    %20 = vector.broadcast %19 : vector<4x1xf32> to vector<4x128xf32>
    %21 = arith.addf %18, %20 : vector<4x128xf32>
    %c0_15 = arith.constant 0 : index
    %c0_16 = arith.constant 0 : index
    %22 = vector.load %arg6[%c0_15, %c0_16] : memref<4x128xf32, #tpu.memory_space<vmem>>, vector<4x128xf32>
    tpu.vector_store %arg6[%c0_15, %c0_16], %21 {strides = array<i32>} : memref<4x128xf32, #tpu.memory_space<vmem>>, vector<4x128xf32>,
    return
  }
  func.func @transform_0(%arg0: i32) -> (i32, i32) {
    %c0_i32 = arith.constant 0 : i32
    %c0_i32_0 = arith.constant 0 : i32
    return %arg0, %c0_i32 : i32, i32
  }
  func.func @transform_1(%arg0: i32) -> (i32, i32) {
    %c0_i32 = arith.constant 0 : i32
    %c0_i32_0 = arith.constant 0 : i32
    %c0_i32_1 = arith.constant 0 : i32
    return %c0_i32, %c0_i32_0 : i32, i32
  }
  func.func @transform_2(%arg0: i32) -> (i32, i32) {
    %c0_i32 = arith.constant 0 : i32
    %c0_i32_0 = arith.constant 0 : i32
    %c0_i32_1 = arith.constant 0 : i32
    return %c0_i32, %c0_i32_0 : i32, i32
  }
  func.func @transform_3(%arg0: i32) -> (i32, i32) {
    %c0_i32 = arith.constant 0 : i32
    %c0_i32_0 = arith.constant 0 : i32
    %c0_i32_1 = arith.constant 0 : i32
    return %c0_i32, %c0_i32_0 : i32, i32
  }
  func.func @transform_4(%arg0: i32) -> (i32, i32) {
    %c0_i32 = arith.constant 0 : i32
    %c0_i32_0 = arith.constant 0 : i32
    %c0_i32_1 = arith.constant 0 : i32
    return %c0_i32, %c0_i32_0 : i32, i32
  }
  func.func @transform_5(%arg0: i32) -> (i32, i32) {
    %c0_i32 = arith.constant 0 : i32
    %c0_i32_0 = arith.constant 0 : i32
    return %c0_i32, %arg0 : i32, i32
  }
}

</mosaic_0001>

<bundles_post_ra>
// kernel: tpu_custom_call.1
= control target key start
LH: loop header
LB: loop body
LE: loop exit
PB: predicated region body
PF: predicated region fallthrough
CT: control target
= control target key end

     0   :  { %vm93_vm0 = vcmask 64512   ;;  %v703_v3 = vmov 0   ;;  %vm359_vm2 = vcmask 523264   ;;  %vm705_vm3 = vmmov 0   ;;  %s928_s0 = inlined_call_operand.vmem [shape: f32[2,8], index: 0, kind: input, shape index: {}]   ;;  %s929_s1 = inlined_call_operand.vmem [shape: f32[64,8], index: 1, kind: input, shape index: {}]   ;;  %s930_s4 = inlined_call_operand.vmem [shape: f32[132,1], index: 4, kind: input, shape index: {}]   ;;  %s931_s2 = inlined_call_operand.vmem [shape: bf16[64,64], index: 2, kind: input, shape index: {}]   ;;  %s932_s3 = inlined_call_operand.vmem [shape: bf16[4,64], index: 3, kind: input, shape index: {}]   ;;  %s933_s5 = inlined_call_operand.vmem [shape: f32[4,2], index: 5, kind: output, shape index: {}]  }
   0x1   :  { %v21_v0 = vld [vmem:[%s928_s0] sm:$0xff]  ;;  %v22_v1 = vld [vmem:[%s928_s0 + $0x8] sm:$0xff]  ;;  %vm744_vm1 = vmpackc.low %vm93_vm0, %vm93_vm0  ;;  %697 = vset.pattern.permute.xlu0 %v703_v3  ;;  %698 = vset.pattern.permute.xlu1 %v703_v3 }
   0x2   :  { %v646_v4 = vpack.c.bf16 %v22_v1, %v21_v0  ;;  %v23_v5 = vld [vmem:[%s928_s0 + $0x10] sm:$0xff]  ;;  %v24_v6 = vld [vmem:[%s928_s0 + $0x18] sm:$0xff]  ;;  %v37_v8 = vld [vmem:[%s929_s1] sm:$0xff] }
   0x3   :  { %v652_v7 = vpack.c.bf16 %v24_v6, %v23_v5  ;;  %v25_v9 = vld [vmem:[%s928_s0 + $0x20] sm:$0xff]  ;;  %v26_v10 = vld [vmem:[%s928_s0 + $0x28] sm:$0xff]  ;;  %606 = vmatprep.mubr.msk.f32.mxu0 %vm93_vm0, %v37_v8  ;;  %v47_v13 = vld [vmem:[%s930_s4 + $0x10] sm:$0xff] }
   0x4   :  { %648 = vmatprep.subr.msk.bf16.mxu0 %vm744_vm1, %v646_v4  ;;  %v45_v11 = vld [vmem:[%s930_s4] sm:$0xff]  ;;  %v658_v12 = vpack.c.bf16 %v26_v10, %v25_v9  ;;  %v46_v14 = vld [vmem:[%s930_s4 + $0x8] sm:$0xff]  ;;  %65 = vperm.xlu1 %698, %v47_v13   ;;  %v48_v15 = vld [vmem:[%s930_s4 + $0x18] sm:$0xff] }
   0x5   :  { %651 = vmatpush3.bf16.xpose.msk.msra.mxu0 %vm744_vm1, %v646_v4  ;;  %55 = vperm.xlu0 %697, %v45_v11   ;;  %v27_v16 = vld [vmem:[%s928_s0 + $0x30] sm:$0xff]  ;;  %v28_v17 = vld [vmem:[%s928_s0 + $0x38] sm:$0xff]  ;;  %v49_v18 = vld [vmem:[%s930_s4 + $0x20] sm:$0xff] }
   0x6   :  { %654 = vmatprep.subr.msk.bf16.mxu0 %vm744_vm1, %v652_v7  ;;  %v50_v19 = vld [vmem:[%s930_s4 + $0x28] sm:$0xff]  ;;  %v664_v20 = vpack.c.bf16 %v28_v17, %v27_v16  ;;  %v51_v21 = vld [vmem:[%s930_s4 + $0x30] sm:$0xff]  ;;  %v52_v22 = vld [vmem:[%s930_s4 + $0x38] sm:$0xff] }
   0x7   :  { %v29_v23 = vld [vmem:[%s928_s0 + $0x40] sm:$0xff]  ;;  %v30_v24 = vld [vmem:[%s928_s0 + $0x48] sm:$0xff]  ;;  %v293_v28 = vld [vmem:[%s930_s4 + $0x50] sm:$0xff] }
   0x8   :  { %70 = vperm.xlu1 %698, %v48_v15   ;;  %v291_v25 = vld [vmem:[%s930_s4 + $0x40] sm:$0xff]  ;;  %v292_v26 = vld [vmem:[%s930_s4 + $0x48] sm:$0xff]  ;;  %v670_v27 = vpack.c.bf16 %v30_v24, %v29_v23  ;;  %v294_v29 = vld [vmem:[%s930_s4 + $0x58] sm:$0xff] }
   0x9   :  { %60 = vperm.xlu0 %697, %v46_v14   ;;  %v31_v30 = vld [vmem:[%s928_s0 + $0x50] sm:$0xff]  ;;  %v32_v31 = vld [vmem:[%s928_s0 + $0x58] sm:$0xff]  ;;  %v295_v32 = vld [vmem:[%s930_s4 + $0x60] sm:$0xff] }
   0xa   :  { %v296_v33 = vld [vmem:[%s930_s4 + $0x68] sm:$0xff]  ;;  %v676_v34 = vpack.c.bf16 %v32_v31, %v31_v30  ;;  %v297_v35 = vld [vmem:[%s930_s4 + $0x70] sm:$0xff]  ;;  %v298_v36 = vld [vmem:[%s930_s4 + $0x78] sm:$0xff] }
   0xb   :  { %v33_v37 = vld [vmem:[%s928_s0 + $0x60] sm:$0xff]  ;;  %v34_v38 = vld [vmem:[%s928_s0 + $0x68] sm:$0xff]  ;;  %v35_v41 = vld [vmem:[%s928_s0 + $0x70] sm:$0xff] }
   0xc   :  { %80 = vperm.xlu1 %698, %v50_v19   ;;  %v450_v39 = vld [vmem:[%s930_s4 + $0x80] sm:$0xf]  ;;  %v682_v40 = vpack.c.bf16 %v34_v38, %v33_v37  ;;  %v36_v42 = vld [vmem:[%s928_s0 + $0x78] sm:$0xff]  ;;  %v38_v44 = vld [vmem:[%s929_s1 + $0x8] sm:$0xff] }
   0xd   :  { %657 = vmatpush3.bf16.xpose.msk.msra.mxu0 %vm744_vm1, %v652_v7  ;;  %75 = vperm.xlu0 %697, %v49_v18   ;;  %v688_v43 = vpack.c.bf16 %v36_v42, %v35_v41  ;;  %v39_v45 = vld [vmem:[%s929_s1 + $0x10] sm:$0xff]  ;;  %v40_v46 = vld [vmem:[%s929_s1 + $0x18] sm:$0xff]  ;;  %v41_v47 = vld [vmem:[%s929_s1 + $0x20] sm:$0xff] }
   0xe   :  { %660 = vmatprep.subr.msk.bf16.mxu0 %vm744_vm1, %v658_v12  ;;  %v42_v48 = vld [vmem:[%s929_s1 + $0x28] sm:$0xff]  ;;  %v43_v49 = vld [vmem:[%s929_s1 + $0x30] sm:$0xff]  ;;  %v44_v50 = vld [vmem:[%s929_s1 + $0x38] sm:$0xff] }
   0xf   :  { %v699_v51 = vld [vmem:[%s931_s2] sm:$0xff]   ;;  %v700_v24 = vld [vmem:[%s931_s2 + $0x8] sm:$0xff]  }
  0x10   :  { %90 = vperm.xlu1 %698, %v52_v22   ;;  %626 = vmatprep.mubr.msk.bf16.mxu1 %vm359_vm2, %v699_v51 }
  0x11   :  { %85 = vperm.xlu0 %697, %v51_v21  }
  0x14   :  { %306 = vperm.xlu1 %698, %v292_v26   ;;  %v702_v26 = vld [vmem:[%s931_s2 + $0x18] sm:$0xff]  }
  0x15   :  { %663 = vmatpush3.bf16.xpose.msk.msra.mxu0 %vm744_vm1, %v658_v12  ;;  %301 = vperm.xlu0 %697, %v291_v25   ;;  %v701_v25 = vld [vmem:[%s931_s2 + $0x10] sm:$0xff]  }
  0x16   :  { %666 = vmatprep.subr.msk.bf16.mxu0 %vm744_vm1, %v664_v20 }
  0x18   :  { %316 = vperm.xlu1 %698, %v294_v29  }
  0x19   :  { %311 = vperm.xlu0 %697, %v293_v28  }
  0x1c   :  { %326 = vperm.xlu1 %698, %v296_v33  }
  0x1d   :  { %669 = vmatpush3.bf16.xpose.msk.msra.mxu0 %vm744_vm1, %v664_v20  ;;  %321 = vperm.xlu0 %697, %v295_v32  }
  0x1e   :  { %672 = vmatprep.subr.msk.bf16.mxu0 %vm744_vm1, %v670_v27 }
  0x20   :  { %336 = vperm.xlu1 %698, %v298_v36  }
  0x21   :  { %331 = vperm.xlu0 %697, %v297_v35  }
  0x25   :  { %675 = vmatpush3.bf16.xpose.msk.msra.mxu0 %vm744_vm1, %v670_v27  ;;  %453 = vperm.xlu0 %697, %v450_v39   ;;  %v704_v27 = vmov 0.0  }
  0x26   :  { %678 = vmatprep.subr.msk.bf16.mxu0 %vm744_vm1, %v676_v34 }
  0x2d   :  { %681 = vmatpush3.bf16.xpose.msk.msra.mxu0 %vm744_vm1, %v676_v34 }
  0x2e   :  { %684 = vmatprep.subr.msk.bf16.mxu0 %vm744_vm1, %v682_v40 }
  0x35   :  { %687 = vmatpush3.bf16.xpose.msk.msra.mxu0 %vm744_vm1, %v682_v40 }
  0x36   :  { %690 = vmatprep.subr.msk.bf16.mxu0 %vm744_vm1, %v688_v43 }
  0x3d   :  { %693 = vmatpush3.bf16.xpose.msk.msra.mxu0 %vm744_vm1, %v688_v43 }
  0x44   :  { %607 = vmatmul.mubr.msk.f32.vlgmr.msra.gmra.mrb[0].mxu0 %vm93_vm0, %v38_v44 }
  0x45   :  { %609 = vmatprep.mubr.msk.f32.mxu0 %vm93_vm0, %v39_v45 }
  0x48   :  { %610 = vmatmul.mubr.msk.f32.gmra.mrb[2].mxu0 %vm93_vm0, %v40_v46 }
  0x49   :  { %612 = vmatprep.mubr.msk.f32.mxu0 %vm93_vm0, %v41_v47 }
  0x4c   :  { %613 = vmatmul.mubr.msk.f32.gmra.mrb[4].mxu0 %vm93_vm0, %v42_v48 }
  0x4d   :  { %615 = vmatprep.mubr.msk.f32.mxu0 %vm93_vm0, %v43_v49 }
  0x50   :  { %616 = vmatmul.mubr.msk.f32.gmra.mrb[6].mxu0 %vm93_vm0, %v44_v50 }
  0x83   :  { %v66_v53 = vpop.permute.xlu1 %65 }
  0x84   :  { %v56_v52 = vpop.permute.xlu0 %55 }
  0x87   :  { %v71_v55 = vpop.permute.xlu1 %70 }
  0x88   :  { %v61_v54 = vpop.permute.xlu0 %60 }
  0x8b   :  { %v81_v1 = vpop.permute.xlu1 %80 }
  0x8c   :  { %v76_v4 = vpop.permute.xlu0 %75 }
  0x8f   :  { %v91_v13 = vpop.permute.xlu1 %90 }
  0x90   :  { %v86_v16 = vpop.permute.xlu0 %85 }
  0x93   :  { %v307_v29 = vpop.permute.xlu1 %306 }
  0x94   :  { %v302_v28 = vpop.permute.xlu0 %301 }
  0x97   :  { %v317_v31 = vpop.permute.xlu1 %316 }
  0x98   :  { %v312_v30 = vpop.permute.xlu0 %311 }
  0x9b   :  { %v327_v40 = vpop.permute.xlu1 %326 }
  0x9c   :  { %v322_v35 = vpop.permute.xlu0 %321 }
  0xa0   :  { %v332_v47 = vpop.permute.xlu0 %331 }
 0x117   :  { %v608_v56 = vpop.f32.mrb[0].mxu0 }
 0x118   :  { %v238_v57 = vadd.f32 %v608_v56, %v61_v54  ;;  %v232_v58 = vpop.f32.mrb[1].mxu0 }
 0x119   :  { %v233_v59 = vadd.f32 %v232_v58, %v56_v52  ;;  %v337_v52 = vpop.permute.xlu1 %336 }
 0x11a   :  { %v272_v60 = vmax.f32 %v238_v57, 0.0 }
 0x11b   :  { %v271_v61 = vmax.f32 %v233_v59, 0.0  ;;  %v611_v62 = vpop.f32.mrb[2].mxu0 }
 0x11c   :  { %v248_v63 = vadd.f32 %v611_v62, %v71_v55  ;;  %v242_v0 = vpop.f32.mrb[3].mxu0 }
 0x11d   :  { %v243_v2 = vadd.f32 %v242_v0, %v66_v53  ;;  %v287_v3 = vpack.c.bf16 %v272_v60, %v271_v61  ;;  %v445_v0 = vld [vmem:[%s932_s3] sm:$0x3] }
 0x11e   :  { %v274_v5 = vmax.f32 %v248_v63, 0.0 }
 0x11f   :  { %v273_v6 = vmax.f32 %v243_v2, 0.0  ;;  %v614_v7 = vpop.f32.mrb[4].mxu0  ;;  %618 = vmatprep.subr.bf16.mxu1 %v287_v3 }
 0x120   :  { %v258_v8 = vadd.f32 %v614_v7, %v81_v1  ;;  %v252_v9 = vpop.f32.mrb[5].mxu0  ;;  %619 = vmatpush3.bf16.msra.mxu1 %v287_v3  ;;  %v454_v1 = vpop.permute.xlu0 %453 }
 0x121   :  { %v288_v10 = vpack.c.bf16 %v274_v5, %v273_v6  ;;  %v253_v11 = vadd.f32 %v252_v9, %v76_v4 }
 0x122   :  { %v276_v12 = vmax.f32 %v258_v8, 0.0 }
 0x123   :  { %v275_v14 = vmax.f32 %v253_v11, 0.0  ;;  %v617_v15 = vpop.f32.mrb[6].mxu0  ;;  %620 = vmatprep.subr.bf16.mxu1 %v288_v10 }
 0x124   :  { %v268_v17 = vadd.f32 %v617_v15, %v91_v13  ;;  %v262_v18 = vpop.f32.mrb[7].mxu0  ;;  %621 = vmatpush3.bf16.msra.mxu1 %v288_v10 }
 0x125   :  { %v289_v19 = vpack.c.bf16 %v276_v12, %v275_v14  ;;  %v263_v20 = vadd.f32 %v262_v18, %v86_v16 }
 0x126   :  { %v278_v21 = vmax.f32 %v268_v17, 0.0 }
 0x127   :  { %v277_v22 = vmax.f32 %v263_v20, 0.0  ;;  %622 = vmatprep.subr.bf16.mxu1 %v289_v19 }
 0x128   :  { %623 = vmatpush3.bf16.msra.mxu1 %v289_v19 }
 0x129   :  { %v290_v23 = vpack.c.bf16 %v278_v21, %v277_v22 }
 0x12b   :  { %624 = vmatprep.subr.bf16.mxu1 %v290_v23 }
 0x12c   :  { %625 = vmatpush3.bf16.msra.mxu1 %v290_v23 }
 0x12d   :  { %634 = vmatprep.subr.bf16.mxu1 %v704_v27 }
 0x12f   :  { %627 = vmatmul.mubr.msk.bf16.vlgmr.msra.gmra.mrb[0].mxu1 %vm359_vm2, %v700_v24 }
 0x130   :  { %630 = vmatprep.mubr.msk.bf16.mxu1 %vm359_vm2, %v701_v25 }
 0x137   :  { %631 = vmatmul.mubr.msk.bf16.gmra.mrb[4].mxu1 %vm359_vm2, %v702_v26 }
 0x138   :  { %642 = vmatprep.mubr.msk.bf16.mxu1 %vm705_vm3, %v704_v27 }
 0x202   :  { %v628_v32 = vpop.f32.mrb[0].mxu1 }
 0x203   :  { %v415_v33 = vadd.f32 %v628_v32, %v312_v30  ;;  %v406_v34 = vpop.f32.mrb[1].mxu1 }
 0x204   :  { %v407_v36 = vadd.f32 %v406_v34, %v302_v28  ;;  %v629_v37 = vpop.f32.mrb[2].mxu1 }
 0x205   :  { %v418_v38 = vadd.f32 %v629_v37, %v317_v31  ;;  %v409_v39 = vpop.f32.mrb[3].mxu1  ;;  %v439_v42 = vmax.f32 %v415_v33, 0.0 }
 0x206   :  { %v410_v41 = vadd.f32 %v409_v39, %v307_v29  ;;  %v437_v44 = vmax.f32 %v407_v36, 0.0 }
 0x207   :  { %v440_v43 = vmax.f32 %v418_v38, 0.0 }
 0x208   :  { %v438_v45 = vmax.f32 %v410_v41, 0.0 }
 0x209   :  { %v447_v46 = vpack.c.bf16 %v440_v43, %v439_v42 }
 0x20a   :  { %v446_v48 = vpack.c.bf16 %v438_v45, %v437_v44  ;;  %v632_v49 = vpop.f32.mrb[4].mxu1 }
 0x20b   :  { %v431_v50 = vadd.f32 %v632_v49, %v332_v47  ;;  %v422_v51 = vpop.f32.mrb[5].mxu1 }
 0x20c   :  { %v423_v53 = vadd.f32 %v422_v51, %v322_v35  ;;  %v633_v54 = vpop.f32.mrb[6].mxu1  ;;  %635 = vmatpush3.bf16.msra.mxu1 %v446_v48 }
 0x20d   :  { %v434_v55 = vadd.f32 %v633_v54, %v337_v52  ;;  %v425_v56 = vpop.f32.mrb[7].mxu1  ;;  %636 = vmatprep.subr.bf16.mxu1 %v704_v27  ;;  %v443_v58 = vmax.f32 %v431_v50, 0.0 }
 0x20e   :  { %v426_v57 = vadd.f32 %v425_v56, %v327_v40  ;;  %v441_v60 = vmax.f32 %v423_v53, 0.0 }
 0x20f   :  { %v444_v59 = vmax.f32 %v434_v55, 0.0 }
 0x210   :  { %v442_v61 = vmax.f32 %v426_v57, 0.0  ;;  %637 = vmatpush3.bf16.msra.mxu1 %v447_v46 }
 0x211   :  { %v449_v62 = vpack.c.bf16 %v444_v59, %v443_v58  ;;  %638 = vmatprep.subr.bf16.mxu1 %v704_v27 }
 0x212   :  { %v448_v63 = vpack.c.bf16 %v442_v61, %v441_v60 }
 0x214   :  { %639 = vmatpush3.bf16.msra.mxu1 %v448_v63 }
 0x215   :  { %640 = vmatprep.subr.bf16.mxu1 %v704_v27 }
 0x218   :  { %641 = vmatpush3.bf16.msra.mxu1 %v449_v62 }
 0x21b   :  { %643 = vmatmul.mubr.msk.bf16.vlgmr.msra.gmra.mrb[8].mxu1 %vm359_vm2, %v445_v0 }
 0x2ee   :  { %v493_v2 = vpop.f32.mrb[8].mxu1 }
 0x2ef   :  { %v494_v3 = vadd.f32 %v493_v2, %v454_v1  ;;  %v644_v4 = vpop.f32.mrb[9].mxu1 }
 0x2f0   :  { %v496_v5 = vpop.f32.mrb[10].mxu1 }
 0x2f1   :  { %499 = vst [vmem:[%s933_s5] sm:$0xf] %v494_v3  ;;  %v645_v6 = vpop.f32.mrb[11].mxu1 }

</bundles_post_ra>
